<compile_context>
chip_gen: v6e
topology: v6e:2x2x1
jax: 0.10.0
libtpu: 0.0.40
codegen_flags: <defaults>
</compile_context>

<pallas_src>
import functools

import jax
import jax.numpy as jnp
from jax.experimental import pallas as pl
from jax.experimental.pallas import tpu as pltpu

LANE = 128


def _round_up(x, m):
    return (x + m - 1) // m * m


def _rgcn_pool_kernel(adj_ref, x_ref, w1_ref, b1_ref, w2_ref, b2_ref, p_ref,
                      out_ref,
                      din_ref, dout_ref, proj_ref, h1_ref,
                      *, num_rels, tile_n):
    """3-phase RGCN + average pooling.  Grid: (phase, dst_tile).

    adj_ref : (R, tile_n, Np) bf16   raw 0/1 adjacency rows for this dst tile
    x_ref   : (Np, Fp)        bf16   node features (resident)
    w1_ref  : (R, Fp, Hp)     bf16   layer-1 weights
    b1_ref  : (1, Hp)         f32    sum over relations of layer-1 biases
    w2_ref  : (R, Hp, Hp)     bf16   layer-2 weights
    b2_ref  : (1, Hp)         f32    sum over relations of layer-2 biases
    p_ref   : (B, tile_n)     f32    average-pooling columns for this tile
    out_ref : (B, Hp)         f32    pooled graph embeddings (accumulator)

    Scratch (persists across the whole grid):
    din_ref : (R, Np, 1)  f32   in-degrees  -> rsqrt(max(deg, 1)) after phase 0
    dout_ref: (R, 1, Np)  f32   out-degrees -> rsqrt(max(deg, 1)) after phase 0
    proj_ref: (R, Np, Hp) bf16  X @ W1_r (phase 1) / h1 @ W2_r (phase 2)
    h1_ref  : (Np, Hp)    bf16  layer-1 activations
    """
    phase = pl.program_id(0)
    tile = pl.program_id(1)
    row0 = pl.multiple_of(tile * tile_n, tile_n)

    # ---------------------- phase 0: degree accumulation ---------------------
    @pl.when(phase == 0)
    def _degrees():
        @pl.when(tile == 0)
        def _init():
            dout_ref[...] = jnp.zeros_like(dout_ref)

        for r in range(num_rels):
            a = adj_ref[r].astype(jnp.float32)                    # (tile_n, Np)
            din_ref[r, pl.ds(row0, tile_n), :] = jnp.sum(a, axis=1, keepdims=True)
            dout_ref[r] = dout_ref[r] + jnp.sum(a, axis=0, keepdims=True)

    # ------ phase 1 prologue (once): finalize norms, project X (hoisted) -----
    @pl.when(jnp.logical_and(phase == 1, tile == 0))
    def _prep_layer1():
        # DGL GraphConv(norm='both') clamps both degrees with clamp(min=1).
        din_ref[...] = jax.lax.rsqrt(jnp.maximum(din_ref[...], 1.0))
        dout_ref[...] = jax.lax.rsqrt(jnp.maximum(dout_ref[...], 1.0))
        x = x_ref[...]
        for r in range(num_rels):
            xw = jnp.dot(x, w1_ref[r], preferred_element_type=jnp.float32)
            proj_ref[r] = xw.astype(proj_ref.dtype)

    # ------ phase 2 prologue (once): project h1 (hoisted), init output -------
    @pl.when(jnp.logical_and(phase == 2, tile == 0))
    def _prep_layer2():
        h1 = h1_ref[...]
        for r in range(num_rels):
            hw = jnp.dot(h1, w2_ref[r], preferred_element_type=jnp.float32)
            proj_ref[r] = hw.astype(proj_ref.dtype)
        # Every pooling row sums to exactly 1, so the layer-2 bias can be added
        # once to the pooled output instead of per node.
        out_ref[...] = jnp.zeros_like(out_ref) + b2_ref[...]

    # ------------------- phases 1 & 2: per-dst-tile graph conv ---------------
    @pl.when(phase > 0)
    def _conv():
        hp = proj_ref.shape[-1]
        acc = jnp.zeros((tile_n, hp), jnp.float32)
        # TODO(synk): for num_rels >> 4 switch this static unroll to
        # lax.fori_loop(..., unroll=True) so temporaries don't stay live.
        for r in range(num_rels):
            # Fold D_out^-1/2 into adjacency columns (cheap sublane broadcast),
            # D_in^-1/2 into the result rows; contraction order is A @ (X @ W).
            a = adj_ref[r] * dout_ref[r].astype(adj_ref.dtype)   # (tile_n, Np) bf16
            m = jnp.dot(a, proj_ref[r], preferred_element_type=jnp.float32)
            acc = acc + din_ref[r, pl.ds(row0, tile_n), :] * m

        @pl.when(phase == 1)
        def _layer1_epilogue():
            h1_ref[pl.ds(row0, tile_n), :] = jnp.maximum(
                acc + b1_ref[...], 0.0).astype(h1_ref.dtype)

        @pl.when(phase == 2)
        def _layer2_epilogue():
            # Average pooling fused into the tile loop: out += P[:, tile] @ h2.
            out_ref[...] += jnp.dot(p_ref[...], acc,
                                    preferred_element_type=jnp.float32)


def _buffer_bytes(shape, itemsize):
    """Coarse (8, 128)-padded VMEM footprint of one buffer."""
    s = list(shape)
    s[-1] = _round_up(s[-1], 128)
    if len(s) >= 2:
        s[-2] = _round_up(s[-2], 8)
    n = 1
    for d in s:
        n *= d
    return n * itemsize


def hetero_classifier_forward(adj, feat, w1, b1, w2, b2, pool):
    """HeteroClassifier.forward: rgcn_combined (2-layer RGCN) + AvgPooling."""
    num_rels, n_nodes, _ = adj.shape
    fin = feat.shape[1]
    hid = w1.shape[-1]
    batch = pool.shape[0]

    # ----- glue: lane-dense padding + bf16 casts (no graph math here) --------
    tile_n = 256 if n_nodes >= 256 else _round_up(n_nodes, 16)
    np_ = _round_up(n_nodes, tile_n)
    fp = _round_up(fin, LANE)
    hp = _round_up(hid, LANE)
    num_tiles = np_ // tile_n

    adj_p = jnp.zeros((num_rels, np_, np_), jnp.bfloat16).at[
        :, :n_nodes, :n_nodes].set(adj.astype(jnp.bfloat16))
    x_p = jnp.zeros((np_, fp), jnp.bfloat16).at[
        :n_nodes, :fin].set(feat.astype(jnp.bfloat16))
    w1_p = jnp.zeros((num_rels, fp, hp), jnp.bfloat16).at[
        :, :fin, :hid].set(w1.astype(jnp.bfloat16))
    w2_p = jnp.zeros((num_rels, hp, hp), jnp.bfloat16).at[
        :, :hid, :hid].set(w2.astype(jnp.bfloat16))
    # Per-relation biases are summed (equivalent under HeteroGraphConv 'sum'
    # aggregation when every relation targets this node type, as here).
    b1_p = jnp.zeros((1, hp), jnp.float32).at[0, :hid].set(
        jnp.sum(b1, axis=0).astype(jnp.float32))
    b2_p = jnp.zeros((1, hp), jnp.float32).at[0, :hid].set(
        jnp.sum(b2, axis=0).astype(jnp.float32))
    pool_p = jnp.zeros((batch, np_), jnp.float32).at[:, :n_nodes].set(
        pool.astype(jnp.float32))

    # ----- VMEM budget: double-buffered blocked inputs + resident scratch ----
    est = (2 * _buffer_bytes((num_rels, tile_n, np_), 2)    # adj tile
           + 2 * _buffer_bytes((np_, fp), 2)                # x
           + 2 * _buffer_bytes((num_rels, fp, hp), 2)       # w1
           + 2 * _buffer_bytes((num_rels, hp, hp), 2)       # w2
           + 4 * _buffer_bytes((1, hp), 4)                  # b1, b2
           + 2 * _buffer_bytes((batch, tile_n), 4)          # pool tile
           + 2 * _buffer_bytes((batch, hp), 4)              # out
           + _buffer_bytes((num_rels, np_, 1), 4)           # in-degrees
           + _buffer_bytes((num_rels, 1, np_), 4)           # out-degrees
           + _buffer_bytes((num_rels, np_, hp), 2)          # projections
           + _buffer_bytes((np_, hp), 2))                   # h1
    vmem_limit = int(min(60 * 2**20, max(32 * 2**20, 2 * est)))

    kernel = functools.partial(_rgcn_pool_kernel, num_rels=num_rels,
                               tile_n=tile_n)

    out = pl.pallas_call(
        kernel,
        out_shape=jax.ShapeDtypeStruct((batch, hp), jnp.float32),
        grid_spec=pltpu.PrefetchScalarGridSpec(
            num_scalar_prefetch=0,
            grid=(3, num_tiles),
            in_specs=[
                pl.BlockSpec((num_rels, tile_n, np_), lambda p, t: (0, t, 0)),
                pl.BlockSpec((np_, fp), lambda p, t: (0, 0)),
                pl.BlockSpec((num_rels, fp, hp), lambda p, t: (0, 0, 0)),
                pl.BlockSpec((1, hp), lambda p, t: (0, 0)),
                pl.BlockSpec((num_rels, hp, hp), lambda p, t: (0, 0, 0)),
                pl.BlockSpec((1, hp), lambda p, t: (0, 0)),
                pl.BlockSpec((batch, tile_n), lambda p, t: (0, t)),
            ],
            out_specs=pl.BlockSpec((batch, hp), lambda p, t: (0, 0)),
            scratch_shapes=[
                pltpu.VMEM((num_rels, np_, 1), jnp.float32),    # rsqrt in-deg
                pltpu.VMEM((num_rels, 1, np_), jnp.float32),    # rsqrt out-deg
                pltpu.VMEM((num_rels, np_, hp), jnp.bfloat16),  # projections
                pltpu.VMEM((np_, hp), jnp.bfloat16),            # h1
            ]),
        compiler_params=pltpu.CompilerParams(
            # Both axes carry cross-iteration deps (degree/h1 scratch, pooled
            # output accumulation), so they must stay "arbitrary".
            # TODO(synk): on v7x shard independent graphs of the batch across
            # the two TensorCores for a true parallel axis.
            dimension_semantics=("arbitrary", "arbitrary"),
            vmem_limit_bytes=vmem_limit),
    )(adj_p, x_p, w1_p, b1_p, w2_p, b2_p, pool_p)
    return out[:, :hid]


def _reference(adj, feat, w1, b1, w2, b2, pool):
    """Pure-JAX f32 reference of the same semantics (validation only)."""
    def norm(a):
        indeg = jnp.maximum(a.sum(axis=1, keepdims=True), 1.0)
        outdeg = jnp.maximum(a.sum(axis=0, keepdims=True), 1.0)
        return a / (jnp.sqrt(indeg) * jnp.sqrt(outdeg))

    num_rels = adj.shape[0]
    h1 = sum(norm(adj[r]) @ feat @ w1[r] + b1[r] for r in range(num_rels))
    h1 = jnp.maximum(h1, 0.0)
    h2 = sum(norm(adj[r]) @ h1 @ w2[r] + b2[r] for r in range(num_rels))
    return pool @ h2


def _make_inputs(key, batch, nodes_per_graph, in_dim, hidden, num_rels):
    """Deterministic synthetic batched graph + RGCN parameters."""
    n = batch * nodes_per_graph
    k_feat, k_adj, k_w1, k_b1, k_w2, k_b2 = jax.random.split(key, 6)

    feat = jax.random.normal(k_feat, (n, in_dim), dtype=jnp.float32)

    gid = jnp.arange(n) // nodes_per_graph
    block_mask = (gid[:, None] == gid[None, :]).astype(jnp.float32)
    rand = jax.random.uniform(k_adj, (num_rels, n, n))
    adj = (rand < 0.4).astype(jnp.float32) * block_mask[None]
    adj = jnp.maximum(adj, jnp.eye(n, dtype=jnp.float32)[None])  # self loops

    w1 = jax.random.normal(k_w1, (num_rels, in_dim, hidden), jnp.float32) * 0.1
    b1 = jax.random.normal(k_b1, (num_rels, hidden), jnp.float32) * 0.01
    w2 = jax.random.normal(k_w2, (num_rels, hidden, hidden), jnp.float32) * 0.1
    b2 = jax.random.normal(k_b2, (num_rels, hidden), jnp.float32) * 0.01

    pool = (gid[None, :] == jnp.arange(batch)[:, None]).astype(jnp.float32)
    pool = pool / nodes_per_graph
    return adj, feat, w1, b1, w2, b2, pool


if __name__ == "__main__":
    # TODO(synk): `classify`, `rgcn_premise`, `rgcn_hypothesis` are created in
    # HeteroClassifier.__init__ but unused by HeteroClassifier.forward, so they
    # are intentionally not part of this kernel.

    # Small case consistent with the module: B=2 graphs x 8 nodes, in_dim=32,
    # hidden=32, R=2 relations (rel_names_short) -> single dst-row tile.
    args_small = _make_inputs(jax.random.PRNGKey(0), batch=2,
                              nodes_per_graph=8, in_dim=32, hidden=32,
                              num_rels=2)
    out_s = jax.block_until_ready(hetero_classifier_forward(*args_small))
    ref_s = _reference(*args_small)
    assert out_s.shape == (2, 32)
    assert jnp.allclose(out_s, ref_s, atol=1e-2, rtol=5e-2), \
        "small-case mismatch vs JAX reference"

    # Second case exercising the multi-tile pipelined path:
    # N = 2 x 160 = 320 nodes -> padded to 512 -> two 256-row dst tiles.
    args_big = _make_inputs(jax.random.PRNGKey(1), batch=2,
                            nodes_per_graph=160, in_dim=48, hidden=64,
                            num_rels=2)
    out_b = jax.block_until_ready(hetero_classifier_forward(*args_big))
    ref_b = _reference(*args_big)
    assert out_b.shape == (2, 64)
    assert jnp.allclose(out_b, ref_b, atol=1e-2, rtol=5e-2), \
        "multi-tile mismatch vs JAX reference"

    print("KERNEL_OK")
</pallas_src>

<mosaic_0001>
module attributes {stable_mosaic.version = 11 : i64} {
  func.func @_rgcn_pool_kernel(%arg0: i32, %arg1: i32, %arg2: memref<2x16x16xbf16, #tpu.memory_space<vmem>>, %arg3: memref<16x128xbf16, #tpu.memory_space<vmem>>, %arg4: memref<2x128x128xbf16, #tpu.memory_space<vmem>>, %arg5: memref<1x128xf32, #tpu.memory_space<vmem>>, %arg6: memref<2x128x128xbf16, #tpu.memory_space<vmem>>, %arg7: memref<1x128xf32, #tpu.memory_space<vmem>>, %arg8: memref<2x16xf32, #tpu.memory_space<vmem>>, %arg9: memref<2x128xf32, #tpu.memory_space<vmem>>, %arg10: memref<2x16x1xf32, #tpu.memory_space<vmem>>, %arg11: memref<2x1x16xf32, #tpu.memory_space<vmem>>, %arg12: memref<2x16x128xbf16, #tpu.memory_space<vmem>>, %arg13: memref<16x128xbf16, #tpu.memory_space<vmem>>) attributes {dimension_semantics = [#tpu.dimension_semantics<arbitrary>, #tpu.dimension_semantics<arbitrary>], iteration_bounds = array<i64: 3, 1>, scalar_prefetch = 0 : i64, scratch_operands = 4 : i64, tpu.core_type = #tpu.core_type<tc>, window_params = [{transform_indices = @transform_0, window_bounds = array<i64: 2, 16, 16>}, {pipeline_mode = #tpu.pipeline_mode<synchronous>, transform_indices = @transform_1, window_bounds = array<i64: 16, 128>}, {pipeline_mode = #tpu.pipeline_mode<synchronous>, transform_indices = @transform_2, window_bounds = array<i64: 2, 128, 128>}, {pipeline_mode = #tpu.pipeline_mode<synchronous>, transform_indices = @transform_3, window_bounds = array<i64: 1, 128>}, {pipeline_mode = #tpu.pipeline_mode<synchronous>, transform_indices = @transform_4, window_bounds = array<i64: 2, 128, 128>}, {pipeline_mode = #tpu.pipeline_mode<synchronous>, transform_indices = @transform_5, window_bounds = array<i64: 1, 128>}, {transform_indices = @transform_6, window_bounds = array<i64: 2, 16>}, {pipeline_mode = #tpu.pipeline_mode<synchronous>, transform_indices = @transform_7, window_bounds = array<i64: 2, 128>}]} {
    %c16_i32 = arith.constant 16 : i32
    %0 = arith.muli %arg1, %c16_i32 : i32
    %1 = tpu.assume_multiple %0, 16 : i32
    %c0_i32 = arith.constant 0 : i32
    %2 = arith.cmpi eq, %arg0, %c0_i32 : i32
    %3 = arith.extui %2 : i1 to i32
    %c0_i32_0 = arith.constant 0 : i32
    %4 = arith.cmpi ne, %3, %c0_i32_0 : i32
    scf.if %4 {
      %c0_i32_7 = arith.constant 0 : i32
      %18 = arith.cmpi eq, %arg1, %c0_i32_7 : i32
      %19 = arith.extui %18 : i1 to i32
      %c0_i32_8 = arith.constant 0 : i32
      %20 = arith.cmpi ne, %19, %c0_i32_8 : i32
      scf.if %20 {
        %cst_32 = arith.constant 0.000000e+00 : f32
        %55 = vector.broadcast %cst_32 : f32 to vector<2x1x16xf32>
        %c0_33 = arith.constant 0 : index
        %c0_34 = arith.constant 0 : index
        %c0_35 = arith.constant 0 : index
        %56 = vector.load %arg11[%c0_33, %c0_34, %c0_35] : memref<2x1x16xf32, #tpu.memory_space<vmem>>, vector<2x1x16xf32>
        tpu.vector_store %arg11[%c0_33, %c0_34, %c0_35], %55 {strides = array<i32>} : memref<2x1x16xf32, #tpu.memory_space<vmem>>, vector<2x1x16xf32>,
      } else {
      }
      %c0 = arith.constant 0 : index
      %c0_9 = arith.constant 0 : index
      %c0_10 = arith.constant 0 : index
      %21 = vector.load %arg2[%c0, %c0_9, %c0_10] : memref<2x16x16xbf16, #tpu.memory_space<vmem>>, vector<1x16x16xbf16>
      %22 = vector.shape_cast %21 : vector<1x16x16xbf16> to vector<16x16xbf16>
      %23 = arith.extf %22 : vector<16x16xbf16> to vector<16x16xf32>
      %cst = arith.constant dense<0.000000e+00> : vector<16xf32>
      %24 = vector.multi_reduction <add>, %23, %cst [1] : vector<16x16xf32> to vector<16xf32>
      %25 = vector.shape_cast %24 : vector<16xf32> to vector<16x1xf32>
      %c0_11 = arith.constant 0 : index
      %26 = arith.index_cast %1 : i32 to index
      %c0_12 = arith.constant 0 : index
      %27 = vector.load %arg10[%c0_11, %26, %c0_12] : memref<2x16x1xf32, #tpu.memory_space<vmem>>, vector<1x16x1xf32>
      %28 = vector.shape_cast %27 : vector<1x16x1xf32> to vector<16x1xf32>
      %29 = vector.shape_cast %25 : vector<16x1xf32> to vector<1x16x1xf32>
      tpu.vector_store %arg10[%c0_11, %26, %c0_12], %29 {strides = array<i32>} : memref<2x16x1xf32, #tpu.memory_space<vmem>>, vector<1x16x1xf32>,
      %c0_13 = arith.constant 0 : index
      %c0_14 = arith.constant 0 : index
      %c0_15 = arith.constant 0 : index
      %30 = vector.load %arg11[%c0_13, %c0_14, %c0_15] : memref<2x1x16xf32, #tpu.memory_space<vmem>>, vector<1x1x16xf32>
      %31 = vector.shape_cast %30 : vector<1x1x16xf32> to vector<1x16xf32>
      %cst_16 = arith.constant dense<0.000000e+00> : vector<16xf32>
      %32 = vector.multi_reduction <add>, %23, %cst_16 [0] : vector<16x16xf32> to vector<16xf32>
      %33 = vector.shape_cast %32 : vector<16xf32> to vector<1x16xf32>
      %34 = arith.addf %31, %33 : vector<1x16xf32>
      %c0_17 = arith.constant 0 : index
      %c0_18 = arith.constant 0 : index
      %c0_19 = arith.constant 0 : index
      %35 = vector.load %arg11[%c0_17, %c0_18, %c0_19] : memref<2x1x16xf32, #tpu.memory_space<vmem>>, vector<1x1x16xf32>
      %36 = vector.shape_cast %35 : vector<1x1x16xf32> to vector<1x16xf32>
      %37 = vector.shape_cast %34 : vector<1x16xf32> to vector<1x1x16xf32>
      tpu.vector_store %arg11[%c0_17, %c0_18, %c0_19], %37 {strides = array<i32>} : memref<2x1x16xf32, #tpu.memory_space<vmem>>, vector<1x1x16xf32>,
      %c1 = arith.constant 1 : index
      %c0_20 = arith.constant 0 : index
      %c0_21 = arith.constant 0 : index
      %38 = vector.load %arg2[%c1, %c0_20, %c0_21] : memref<2x16x16xbf16, #tpu.memory_space<vmem>>, vector<1x16x16xbf16>
      %39 = vector.shape_cast %38 : vector<1x16x16xbf16> to vector<16x16xbf16>
      %40 = arith.extf %39 : vector<16x16xbf16> to vector<16x16xf32>
      %cst_22 = arith.constant dense<0.000000e+00> : vector<16xf32>
      %41 = vector.multi_reduction <add>, %40, %cst_22 [1] : vector<16x16xf32> to vector<16xf32>
      %42 = vector.shape_cast %41 : vector<16xf32> to vector<16x1xf32>
      %c1_23 = arith.constant 1 : index
      %43 = arith.index_cast %1 : i32 to index
      %c0_24 = arith.constant 0 : index
      %44 = vector.load %arg10[%c1_23, %43, %c0_24] : memref<2x16x1xf32, #tpu.memory_space<vmem>>, vector<1x16x1xf32>
      %45 = vector.shape_cast %44 : vector<1x16x1xf32> to vector<16x1xf32>
      %46 = vector.shape_cast %42 : vector<16x1xf32> to vector<1x16x1xf32>
      tpu.vector_store %arg10[%c1_23, %43, %c0_24], %46 {strides = array<i32>} : memref<2x16x1xf32, #tpu.memory_space<vmem>>, vector<1x16x1xf32>,
      %c1_25 = arith.constant 1 : index
      %c0_26 = arith.constant 0 : index
      %c0_27 = arith.constant 0 : index
      %47 = vector.load %arg11[%c1_25, %c0_26, %c0_27] : memref<2x1x16xf32, #tpu.memory_space<vmem>>, vector<1x1x16xf32>
      %48 = vector.shape_cast %47 : vector<1x1x16xf32> to vector<1x16xf32>
      %cst_28 = arith.constant dense<0.000000e+00> : vector<16xf32>
      %49 = vector.multi_reduction <add>, %40, %cst_28 [0] : vector<16x16xf32> to vector<16xf32>
      %50 = vector.shape_cast %49 : vector<16xf32> to vector<1x16xf32>
      %51 = arith.addf %48, %50 : vector<1x16xf32>
      %c1_29 = arith.constant 1 : index
      %c0_30 = arith.constant 0 : index
      %c0_31 = arith.constant 0 : index
      %52 = vector.load %arg11[%c1_29, %c0_30, %c0_31] : memref<2x1x16xf32, #tpu.memory_space<vmem>>, vector<1x1x16xf32>
      %53 = vector.shape_cast %52 : vector<1x1x16xf32> to vector<1x16xf32>
      %54 = vector.shape_cast %51 : vector<1x16xf32> to vector<1x1x16xf32>
      tpu.vector_store %arg11[%c1_29, %c0_30, %c0_31], %54 {strides = array<i32>} : memref<2x1x16xf32, #tpu.memory_space<vmem>>, vector<1x1x16xf32>,
    } else {
    }
    %c1_i32 = arith.constant 1 : i32
    %5 = arith.cmpi eq, %arg0, %c1_i32 : i32
    %c0_i32_1 = arith.constant 0 : i32
    %6 = arith.cmpi eq, %arg1, %c0_i32_1 : i32
    %7 = arith.andi %5, %6 : i1
    %8 = arith.extui %7 : i1 to i32
    %c0_i32_2 = arith.constant 0 : i32
    %9 = arith.cmpi ne, %8, %c0_i32_2 : i32
    scf.if %9 {
      %c0 = arith.constant 0 : index
      %c0_7 = arith.constant 0 : index
      %c0_8 = arith.constant 0 : index
      %18 = vector.load %arg10[%c0, %c0_7, %c0_8] : memref<2x16x1xf32, #tpu.memory_space<vmem>>, vector<2x16x1xf32>
      %cst = arith.constant 1.000000e+00 : f32
      %19 = vector.broadcast %cst : f32 to vector<2x16x1xf32>
      %20 = arith.maximumf %18, %19 : vector<2x16x1xf32>
      %21 = math.rsqrt %20 : vector<2x16x1xf32>
      %c0_9 = arith.constant 0 : index
      %c0_10 = arith.constant 0 : index
      %c0_11 = arith.constant 0 : index
      %22 = vector.load %arg10[%c0_9, %c0_10, %c0_11] : memref<2x16x1xf32, #tpu.memory_space<vmem>>, vector<2x16x1xf32>
      tpu.vector_store %arg10[%c0_9, %c0_10, %c0_11], %21 {strides = array<i32>} : memref<2x16x1xf32, #tpu.memory_space<vmem>>, vector<2x16x1xf32>,
      %c0_12 = arith.constant 0 : index
      %c0_13 = arith.constant 0 : index
      %c0_14 = arith.constant 0 : index
      %23 = vector.load %arg11[%c0_12, %c0_13, %c0_14] : memref<2x1x16xf32, #tpu.memory_space<vmem>>, vector<2x1x16xf32>
      %cst_15 = arith.constant 1.000000e+00 : f32
      %24 = vector.broadcast %cst_15 : f32 to vector<2x1x16xf32>
      %25 = arith.maximumf %23, %24 : vector<2x1x16xf32>
      %26 = math.rsqrt %25 : vector<2x1x16xf32>
      %c0_16 = arith.constant 0 : index
      %c0_17 = arith.constant 0 : index
      %c0_18 = arith.constant 0 : index
      %27 = vector.load %arg11[%c0_16, %c0_17, %c0_18] : memref<2x1x16xf32, #tpu.memory_space<vmem>>, vector<2x1x16xf32>
      tpu.vector_store %arg11[%c0_16, %c0_17, %c0_18], %26 {strides = array<i32>} : memref<2x1x16xf32, #tpu.memory_space<vmem>>, vector<2x1x16xf32>,
      %c0_19 = arith.constant 0 : index
      %c0_20 = arith.constant 0 : index
      %28 = vector.load %arg3[%c0_19, %c0_20] : memref<16x128xbf16, #tpu.memory_space<vmem>>, vector<16x128xbf16>
      %c0_21 = arith.constant 0 : index
      %c0_22 = arith.constant 0 : index
      %c0_23 = arith.constant 0 : index
      %29 = vector.load %arg4[%c0_21, %c0_22, %c0_23] : memref<2x128x128xbf16, #tpu.memory_space<vmem>>, vector<1x128x128xbf16>
      %30 = vector.shape_cast %29 : vector<1x128x128xbf16> to vector<128x128xbf16>
      %cst_24 = arith.constant dense<0.000000e+00> : vector<16x128xf32>
      %31 = tpu.matmul %28, %30, %cst_24 {dimension_numbers = #tpu.dot_dimension_numbers<[1], [0], [0], [1], [0, 0, 1, 1], [], []>} : vector<16x128xbf16>, vector<128x128xbf16>, vector<16x128xf32> -> vector<16x128xf32>
      %32 = arith.truncf %31 : vector<16x128xf32> to vector<16x128xbf16>
      %c0_25 = arith.constant 0 : index
      %c0_26 = arith.constant 0 : index
      %c0_27 = arith.constant 0 : index
      %33 = vector.load %arg12[%c0_25, %c0_26, %c0_27] : memref<2x16x128xbf16, #tpu.memory_space<vmem>>, vector<1x16x128xbf16>
      %34 = vector.shape_cast %33 : vector<1x16x128xbf16> to vector<16x128xbf16>
      %35 = vector.shape_cast %32 : vector<16x128xbf16> to vector<1x16x128xbf16>
      tpu.vector_store %arg12[%c0_25, %c0_26, %c0_27], %35 {strides = array<i32>} : memref<2x16x128xbf16, #tpu.memory_space<vmem>>, vector<1x16x128xbf16>,
      %c1 = arith.constant 1 : index
      %c0_28 = arith.constant 0 : index
      %c0_29 = arith.constant 0 : index
      %36 = vector.load %arg4[%c1, %c0_28, %c0_29] : memref<2x128x128xbf16, #tpu.memory_space<vmem>>, vector<1x128x128xbf16>
      %37 = vector.shape_cast %36 : vector<1x128x128xbf16> to vector<128x128xbf16>
      %cst_30 = arith.constant dense<0.000000e+00> : vector<16x128xf32>
      %38 = tpu.matmul %28, %37, %cst_30 {dimension_numbers = #tpu.dot_dimension_numbers<[1], [0], [0], [1], [0, 0, 1, 1], [], []>} : vector<16x128xbf16>, vector<128x128xbf16>, vector<16x128xf32> -> vector<16x128xf32>
      %39 = arith.truncf %38 : vector<16x128xf32> to vector<16x128xbf16>
      %c1_31 = arith.constant 1 : index
      %c0_32 = arith.constant 0 : index
      %c0_33 = arith.constant 0 : index
      %40 = vector.load %arg12[%c1_31, %c0_32, %c0_33] : memref<2x16x128xbf16, #tpu.memory_space<vmem>>, vector<1x16x128xbf16>
      %41 = vector.shape_cast %40 : vector<1x16x128xbf16> to vector<16x128xbf16>
      %42 = vector.shape_cast %39 : vector<16x128xbf16> to vector<1x16x128xbf16>
      tpu.vector_store %arg12[%c1_31, %c0_32, %c0_33], %42 {strides = array<i32>} : memref<2x16x128xbf16, #tpu.memory_space<vmem>>, vector<1x16x128xbf16>,
    } else {
    }
    %c2_i32 = arith.constant 2 : i32
    %10 = arith.cmpi eq, %arg0, %c2_i32 : i32
    %c0_i32_3 = arith.constant 0 : i32
    %11 = arith.cmpi eq, %arg1, %c0_i32_3 : i32
    %12 = arith.andi %10, %11 : i1
    %13 = arith.extui %12 : i1 to i32
    %c0_i32_4 = arith.constant 0 : i32
    %14 = arith.cmpi ne, %13, %c0_i32_4 : i32
    scf.if %14 {
      %c0 = arith.constant 0 : index
      %c0_7 = arith.constant 0 : index
      %18 = vector.load %arg13[%c0, %c0_7] : memref<16x128xbf16, #tpu.memory_space<vmem>>, vector<16x128xbf16>
      %c0_8 = arith.constant 0 : index
      %c0_9 = arith.constant 0 : index
      %c0_10 = arith.constant 0 : index
      %19 = vector.load %arg6[%c0_8, %c0_9, %c0_10] : memref<2x128x128xbf16, #tpu.memory_space<vmem>>, vector<1x128x128xbf16>
      %20 = vector.shape_cast %19 : vector<1x128x128xbf16> to vector<128x128xbf16>
      %cst = arith.constant dense<0.000000e+00> : vector<16x128xf32>
      %21 = tpu.matmul %18, %20, %cst {dimension_numbers = #tpu.dot_dimension_numbers<[1], [0], [0], [1], [0, 0, 1, 1], [], []>} : vector<16x128xbf16>, vector<128x128xbf16>, vector<16x128xf32> -> vector<16x128xf32>
      %22 = arith.truncf %21 : vector<16x128xf32> to vector<16x128xbf16>
      %c0_11 = arith.constant 0 : index
      %c0_12 = arith.constant 0 : index
      %c0_13 = arith.constant 0 : index
      %23 = vector.load %arg12[%c0_11, %c0_12, %c0_13] : memref<2x16x128xbf16, #tpu.memory_space<vmem>>, vector<1x16x128xbf16>
      %24 = vector.shape_cast %23 : vector<1x16x128xbf16> to vector<16x128xbf16>
      %25 = vector.shape_cast %22 : vector<16x128xbf16> to vector<1x16x128xbf16>
      tpu.vector_store %arg12[%c0_11, %c0_12, %c0_13], %25 {strides = array<i32>} : memref<2x16x128xbf16, #tpu.memory_space<vmem>>, vector<1x16x128xbf16>,
      %c1 = arith.constant 1 : index
      %c0_14 = arith.constant 0 : index
      %c0_15 = arith.constant 0 : index
      %26 = vector.load %arg6[%c1, %c0_14, %c0_15] : memref<2x128x128xbf16, #tpu.memory_space<vmem>>, vector<1x128x128xbf16>
      %27 = vector.shape_cast %26 : vector<1x128x128xbf16> to vector<128x128xbf16>
      %cst_16 = arith.constant dense<0.000000e+00> : vector<16x128xf32>
      %28 = tpu.matmul %18, %27, %cst_16 {dimension_numbers = #tpu.dot_dimension_numbers<[1], [0], [0], [1], [0, 0, 1, 1], [], []>} : vector<16x128xbf16>, vector<128x128xbf16>, vector<16x128xf32> -> vector<16x128xf32>
      %29 = arith.truncf %28 : vector<16x128xf32> to vector<16x128xbf16>
      %c1_17 = arith.constant 1 : index
      %c0_18 = arith.constant 0 : index
      %c0_19 = arith.constant 0 : index
      %30 = vector.load %arg12[%c1_17, %c0_18, %c0_19] : memref<2x16x128xbf16, #tpu.memory_space<vmem>>, vector<1x16x128xbf16>
      %31 = vector.shape_cast %30 : vector<1x16x128xbf16> to vector<16x128xbf16>
      %32 = vector.shape_cast %29 : vector<16x128xbf16> to vector<1x16x128xbf16>
      tpu.vector_store %arg12[%c1_17, %c0_18, %c0_19], %32 {strides = array<i32>} : memref<2x16x128xbf16, #tpu.memory_space<vmem>>, vector<1x16x128xbf16>,
      %cst_20 = arith.constant 0.000000e+00 : f32
      %33 = vector.broadcast %cst_20 : f32 to vector<2x128xf32>
      %c0_21 = arith.constant 0 : index
      %c0_22 = arith.constant 0 : index
      %34 = vector.load %arg7[%c0_21, %c0_22] : memref<1x128xf32, #tpu.memory_space<vmem>>, vector<1x128xf32>
      %35 = vector.broadcast %34 : vector<1x128xf32> to vector<2x128xf32>
      %36 = arith.addf %33, %35 : vector<2x128xf32>
      %c0_23 = arith.constant 0 : index
      %c0_24 = arith.constant 0 : index
      %37 = vector.load %arg9[%c0_23, %c0_24] : memref<2x128xf32, #tpu.memory_space<vmem>>, vector<2x128xf32>
      tpu.vector_store %arg9[%c0_23, %c0_24], %36 {strides = array<i32>} : memref<2x128xf32, #tpu.memory_space<vmem>>, vector<2x128xf32>,
    } else {
    }
    %c0_i32_5 = arith.constant 0 : i32
    %15 = arith.cmpi sgt, %arg0, %c0_i32_5 : i32
    %16 = arith.extui %15 : i1 to i32
    %c0_i32_6 = arith.constant 0 : i32
    %17 = arith.cmpi ne, %16, %c0_i32_6 : i32
    scf.if %17 {
      %cst = arith.constant 0.000000e+00 : f32
      %18 = vector.broadcast %cst : f32 to vector<16x128xf32>
      %c0 = arith.constant 0 : index
      %c0_7 = arith.constant 0 : index
      %c0_8 = arith.constant 0 : index
      %19 = vector.load %arg2[%c0, %c0_7, %c0_8] : memref<2x16x16xbf16, #tpu.memory_space<vmem>>, vector<1x16x16xbf16>
      %20 = vector.shape_cast %19 : vector<1x16x16xbf16> to vector<16x16xbf16>
      %c0_9 = arith.constant 0 : index
      %c0_10 = arith.constant 0 : index
      %c0_11 = arith.constant 0 : index
      %21 = vector.load %arg11[%c0_9, %c0_10, %c0_11] : memref<2x1x16xf32, #tpu.memory_space<vmem>>, vector<1x1x16xf32>
      %22 = vector.shape_cast %21 : vector<1x1x16xf32> to vector<1x16xf32>
      %23 = arith.truncf %22 : vector<1x16xf32> to vector<1x16xbf16>
      %24 = vector.broadcast %23 : vector<1x16xbf16> to vector<16x16xbf16>
      %25 = arith.mulf %20, %24 : vector<16x16xbf16>
      %c0_12 = arith.constant 0 : index
      %c0_13 = arith.constant 0 : index
      %c0_14 = arith.constant 0 : index
      %26 = vector.load %arg12[%c0_12, %c0_13, %c0_14] : memref<2x16x128xbf16, #tpu.memory_space<vmem>>, vector<1x16x128xbf16>
      %27 = vector.shape_cast %26 : vector<1x16x128xbf16> to vector<16x128xbf16>
      %cst_15 = arith.constant dense<0.000000e+00> : vector<16x128xf32>
      %28 = tpu.matmul %25, %27, %cst_15 {dimension_numbers = #tpu.dot_dimension_numbers<[1], [0], [0], [1], [0, 0, 1, 1], [], []>} : vector<16x16xbf16>, vector<16x128xbf16>, vector<16x128xf32> -> vector<16x128xf32>
      %c0_16 = arith.constant 0 : index
      %29 = arith.index_cast %1 : i32 to index
      %c0_17 = arith.constant 0 : index
      %30 = vector.load %arg10[%c0_16, %29, %c0_17] : memref<2x16x1xf32, #tpu.memory_space<vmem>>, vector<1x16x1xf32>
      %31 = vector.shape_cast %30 : vector<1x16x1xf32> to vector<16x1xf32>
      %32 = vector.broadcast %31 : vector<16x1xf32> to vector<16x128xf32>
      %33 = arith.mulf %32, %28 : vector<16x128xf32>
      %34 = arith.addf %18, %33 : vector<16x128xf32>
      %c1 = arith.constant 1 : index
      %c0_18 = arith.constant 0 : index
      %c0_19 = arith.constant 0 : index
      %35 = vector.load %arg2[%c1, %c0_18, %c0_19] : memref<2x16x16xbf16, #tpu.memory_space<vmem>>, vector<1x16x16xbf16>
      %36 = vector.shape_cast %35 : vector<1x16x16xbf16> to vector<16x16xbf16>
      %c1_20 = arith.constant 1 : index
      %c0_21 = arith.constant 0 : index
      %c0_22 = arith.constant 0 : index
      %37 = vector.load %arg11[%c1_20, %c0_21, %c0_22] : memref<2x1x16xf32, #tpu.memory_space<vmem>>, vector<1x1x16xf32>
      %38 = vector.shape_cast %37 : vector<1x1x16xf32> to vector<1x16xf32>
      %39 = arith.truncf %38 : vector<1x16xf32> to vector<1x16xbf16>
      %40 = vector.broadcast %39 : vector<1x16xbf16> to vector<16x16xbf16>
      %41 = arith.mulf %36, %40 : vector<16x16xbf16>
      %c1_23 = arith.constant 1 : index
      %c0_24 = arith.constant 0 : index
      %c0_25 = arith.constant 0 : index
      %42 = vector.load %arg12[%c1_23, %c0_24, %c0_25] : memref<2x16x128xbf16, #tpu.memory_space<vmem>>, vector<1x16x128xbf16>
      %43 = vector.shape_cast %42 : vector<1x16x128xbf16> to vector<16x128xbf16>
      %cst_26 = arith.constant dense<0.000000e+00> : vector<16x128xf32>
      %44 = tpu.matmul %41, %43, %cst_26 {dimension_numbers = #tpu.dot_dimension_numbers<[1], [0], [0], [1], [0, 0, 1, 1], [], []>} : vector<16x16xbf16>, vector<16x128xbf16>, vector<16x128xf32> -> vector<16x128xf32>
      %c1_27 = arith.constant 1 : index
      %45 = arith.index_cast %1 : i32 to index
      %c0_28 = arith.constant 0 : index
      %46 = vector.load %arg10[%c1_27, %45, %c0_28] : memref<2x16x1xf32, #tpu.memory_space<vmem>>, vector<1x16x1xf32>
      %47 = vector.shape_cast %46 : vector<1x16x1xf32> to vector<16x1xf32>
      %48 = vector.broadcast %47 : vector<16x1xf32> to vector<16x128xf32>
      %49 = arith.mulf %48, %44 : vector<16x128xf32>
      %50 = arith.addf %34, %49 : vector<16x128xf32>
      %c1_i32_29 = arith.constant 1 : i32
      %51 = arith.cmpi eq, %arg0, %c1_i32_29 : i32
      %52 = arith.extui %51 : i1 to i32
      %c0_i32_30 = arith.constant 0 : i32
      %53 = arith.cmpi ne, %52, %c0_i32_30 : i32
      scf.if %53 {
        %c0_33 = arith.constant 0 : index
        %c0_34 = arith.constant 0 : index
        %57 = vector.load %arg5[%c0_33, %c0_34] : memref<1x128xf32, #tpu.memory_space<vmem>>, vector<1x128xf32>
        %58 = vector.broadcast %57 : vector<1x128xf32> to vector<16x128xf32>
        %59 = arith.addf %50, %58 : vector<16x128xf32>
        %cst_35 = arith.constant 0.000000e+00 : f32
        %60 = vector.broadcast %cst_35 : f32 to vector<16x128xf32>
        %61 = arith.maximumf %59, %60 : vector<16x128xf32>
        %62 = arith.truncf %61 : vector<16x128xf32> to vector<16x128xbf16>
        %63 = arith.index_cast %1 : i32 to index
        %c0_36 = arith.constant 0 : index
        %64 = vector.load %arg13[%63, %c0_36] : memref<16x128xbf16, #tpu.memory_space<vmem>>, vector<16x128xbf16>
        tpu.vector_store %arg13[%63, %c0_36], %62 {strides = array<i32>} : memref<16x128xbf16, #tpu.memory_space<vmem>>, vector<16x128xbf16>,
      } else {
      }
      %c2_i32_31 = arith.constant 2 : i32
      %54 = arith.cmpi eq, %arg0, %c2_i32_31 : i32
      %55 = arith.extui %54 : i1 to i32
      %c0_i32_32 = arith.constant 0 : i32
      %56 = arith.cmpi ne, %55, %c0_i32_32 : i32
      scf.if %56 {
        %c0_33 = arith.constant 0 : index
        %c0_34 = arith.constant 0 : index
        %57 = vector.load %arg9[%c0_33, %c0_34] : memref<2x128xf32, #tpu.memory_space<vmem>>, vector<2x128xf32>
        %c0_35 = arith.constant 0 : index
        %c0_36 = arith.constant 0 : index
        %58 = vector.load %arg8[%c0_35, %c0_36] : memref<2x16xf32, #tpu.memory_space<vmem>>, vector<2x16xf32>
        %cst_37 = arith.constant dense<0.000000e+00> : vector<2x128xf32>
        %59 = tpu.matmul %58, %50, %cst_37 {dimension_numbers = #tpu.dot_dimension_numbers<[1], [0], [0], [1], [0, 0, 1, 1], [], []>} : vector<2x16xf32>, vector<16x128xf32>, vector<2x128xf32> -> vector<2x128xf32>
        %60 = arith.addf %57, %59 : vector<2x128xf32>
        %c0_38 = arith.constant 0 : index
        %c0_39 = arith.constant 0 : index
        %61 = vector.load %arg9[%c0_38, %c0_39] : memref<2x128xf32, #tpu.memory_space<vmem>>, vector<2x128xf32>
        tpu.vector_store %arg9[%c0_38, %c0_39], %60 {strides = array<i32>} : memref<2x128xf32, #tpu.memory_space<vmem>>, vector<2x128xf32>,
      } else {
      }
    } else {
    }
    return
  }
  func.func @transform_0(%arg0: i32, %arg1: i32) -> (i32, i32, i32) {
    %c0_i32 = arith.constant 0 : i32
    %c0_i32_0 = arith.constant 0 : i32
    %c0_i32_1 = arith.constant 0 : i32
    return %c0_i32, %arg1, %c0_i32_0 : i32, i32, i32
  }
  func.func @transform_1(%arg0: i32, %arg1: i32) -> (i32, i32) {
    %c0_i32 = arith.constant 0 : i32
    %c0_i32_0 = arith.constant 0 : i32
    %c0_i32_1 = arith.constant 0 : i32
    return %c0_i32, %c0_i32_0 : i32, i32
  }
  func.func @transform_2(%arg0: i32, %arg1: i32) -> (i32, i32, i32) {
    %c0_i32 = arith.constant 0 : i32
    %c0_i32_0 = arith.constant 0 : i32
    %c0_i32_1 = arith.constant 0 : i32
    %c0_i32_2 = arith.constant 0 : i32
    return %c0_i32, %c0_i32_0, %c0_i32_1 : i32, i32, i32
  }
  func.func @transform_3(%arg0: i32, %arg1: i32) -> (i32, i32) {
    %c0_i32 = arith.constant 0 : i32
    %c0_i32_0 = arith.constant 0 : i32
    %c0_i32_1 = arith.constant 0 : i32
    return %c0_i32, %c0_i32_0 : i32, i32
  }
  func.func @transform_4(%arg0: i32, %arg1: i32) -> (i32, i32, i32) {
    %c0_i32 = arith.constant 0 : i32
    %c0_i32_0 = arith.constant 0 : i32
    %c0_i32_1 = arith.constant 0 : i32
    %c0_i32_2 = arith.constant 0 : i32
    return %c0_i32, %c0_i32_0, %c0_i32_1 : i32, i32, i32
  }
  func.func @transform_5(%arg0: i32, %arg1: i32) -> (i32, i32) {
    %c0_i32 = arith.constant 0 : i32
    %c0_i32_0 = arith.constant 0 : i32
    %c0_i32_1 = arith.constant 0 : i32
    return %c0_i32, %c0_i32_0 : i32, i32
  }
  func.func @transform_6(%arg0: i32, %arg1: i32) -> (i32, i32) {
    %c0_i32 = arith.constant 0 : i32
    %c0_i32_0 = arith.constant 0 : i32
    return %c0_i32, %arg1 : i32, i32
  }
  func.func @transform_7(%arg0: i32, %arg1: i32) -> (i32, i32) {
    %c0_i32 = arith.constant 0 : i32
    %c0_i32_0 = arith.constant 0 : i32
    %c0_i32_1 = arith.constant 0 : i32
    return %c0_i32, %c0_i32_0 : i32, i32
  }
}

</mosaic_0001>

<bundles_post_ra>
// kernel: tpu_custom_call.1
= control target key start
LH: loop header
LB: loop body
LE: loop exit
PB: predicated region body
PF: predicated region fallthrough
CT: control target
= control target key end

     0   :  { %12 = vsyncpa [#allocation7], 0  ;;  %s2147_s0 = inlined_call_operand.hbm [shape: bf16[2,16,16], index: 0, kind: input, shape index: {}]   ;;  %s2148_s1 = inlined_call_operand.hbm [shape: bf16[16,128], index: 1, kind: input, shape index: {}]   ;;  %s2149_s2 = inlined_call_operand.hbm [shape: bf16[2,128,128], index: 2, kind: input, shape index: {}]   ;;  %s2150_s3 = inlined_call_operand.vmem [shape: f32[1,128], index: 3, kind: input, shape index: {}]   ;;  %s2151_s4 = inlined_call_operand.hbm [shape: bf16[2,128,128], index: 4, kind: input, shape index: {}]   ;;  %s2152_s5 = inlined_call_operand.vmem [shape: f32[1,128], index: 5, kind: input, shape index: {}]   ;;  %s2153_s6 = inlined_call_operand.vmem [shape: f32[2,16], index: 6, kind: input, shape index: {}]   ;;  %s2154_s7 = inlined_call_operand.hbm [shape: f32[2,128], index: 7, kind: output, shape index: {}]  }
   0x1   :  { %13 = vsyncpa [#allocation10], 0 }
   0x2   :  { %14 = vsyncpa [#allocation13], 0 }
   0x3   :  { %15 = vsyncpa [#allocation8], 0  ;;  %s1972_s24 = smov 0   ;;  %s1974_s25 = smov 0  }
   0x4   :  { %s1976_s26 = smov 0  }
   0x5 LB: > { %s1345_s27 = sadd.s32 4294967295, %s1913_s26   ;;  %p1346_p0 = scmp.ge.s32.totalorder %s1913_s26, 1  ;;  %s1913_s26 = sphi %s1976_s26, %s21_s26   ;;  %s1909_s25 = sphi %s1974_s25, %s2161_s25   ;;  %s1905_s24 = sphi %s1972_s24, %s2160_s24  }
   0x6   : > { %p216_p1 = scmp.lt.s32.totalorder %s1913_s26, 4  ;;  %p1992_p2 = scmp.eq.s32.totalorder %s1345_s27, 0 }
   0x7   : > { %s1915_s30 = smov [#allocation9]   ;;  %s33_s10 = sadd.s32 1, %s1909_s25 }
   0x8   : > { %p1996_p3 = pnand %p1346_p0, %p216_p1  ;;  %s244_s8 = sshll.u32 %s1915_s30, 4  ;;  %s245_s8 = int_to_ptr.vmem [resolvable:$true] %s244_s8 }
   0x9   : > { %p2009_p6 = scmp.ge.s32.totalorder %s33_s10, 3  ;;  %s1916_s12 = smov [#allocation6]  }
   0xa   : > { %p1633_p4 = pneg %p1996_p3  ;;  %s231_s13 = sshll.u32 %s1916_s12, 4  ;;  %s232_s13 = int_to_ptr.vmem [resolvable:$true] %s231_s13 }
   0xb   : > { %s1758_s14 = scalar_lea.vmem %s245_s8, 128  ;;  %p1766_p11 = scmp.lt.s32.totalorder %s245_s8, %s245_s8 }
   0xc   : > { %p2004_p5 = pnand %p1992_p2, %p1633_p4  ;;  %p1759_p8 = scmp.ne.s32.totalorder %s245_s8, %s1758_s14 }
   0xd   : > { %p1767_p12 = scmp.lt.s32.totalorder %s1758_s14, %s1758_s14 }
   0xe   : > { %p1749_p7 = pneg %p2004_p5 }
   0xf   : > { %p1768_p13 = por %p1767_p12, %p1766_p11 }
  0x10   : > { %p1761_p9 = pnand %p1759_p8, %p1749_p7 }
  0x12   : > { %p1762_p10 = pneg %p1761_p9 }
  0x14   : > { %p1769_p0 = pnand %p1768_p13, %p1762_p10 }
  0x16   : > { %1772 = shalt.err (!%p1769_p0)
}
  0x17   : > { %s1917_s15 = smov 64   ;;  %s1918_s16 = smov 4  }
  0x18   : > { %1639 = dma.hbm_to_vmem [thread:$0]  (!%p2004_p5), %s2148_s1, 128, %s245_s8, [#allocation10], %s1917_s15, %s1917_s15, %s1918_s16  }
  0x19   : > { %s2163_s10 = smov (%p2009_p6, %s33_s10), 0  ;;  %s1784_s19 = scalar_lea.vmem %s232_s13, 256 }
  0x1a   : > { %p1785_p1 = scmp.ne.s32.totalorder %s232_s13, %s1784_s19  ;;  %p1792_p9 = scmp.lt.s32.totalorder %s232_s13, %s232_s13 }
  0x1b   : > { %p1793_p10 = scmp.lt.s32.totalorder %s1784_s19, %s1784_s19 }
  0x1c   : > { %p1787_p4 = pnand %p1785_p1, %p1749_p7 }
  0x1d   : > { %p1794_p11 = por %p1793_p10, %p1792_p9 }
  0x1e   : > { %p1788_p8 = pneg %p1787_p4 }
  0x20   : > { %p1795_p12 = pnand %p1794_p11, %p1788_p8 }
  0x22   : > { %1798 = shalt.err (!%p1795_p12)
}
  0x23   : > { %1636 = dma.hbm_to_vmem [thread:$0]  (!%p2004_p5), %s2147_s0, 256, %s232_s13, [#allocation7], %s1917_s15, %s1917_s15, %s1918_s16  }
  0x24   : > { %s1919_s22 = smov [#allocation11]   ;;  %s1920_s30 = smov [#allocation12]  }
  0x25   : > { %s257_s23 = sshll.u32 %s1919_s22, 4  ;;  %s273_s8 = sshll.u32 %s1920_s30, 4  ;;  %s258_s23 = int_to_ptr.vmem [resolvable:$true] %s257_s23  ;;  %s274_s8 = int_to_ptr.vmem [resolvable:$true] %s273_s8 }
  0x26   : > { %s1810_s11 = scalar_lea.vmem %s258_s23, 2048  ;;  %p1818_p1 = scmp.lt.s32.totalorder %s258_s23, %s258_s23 }
  0x27   : > { %p1811_p6 = scmp.ne.s32.totalorder %s258_s23, %s1810_s11  ;;  %p1819_p4 = scmp.lt.s32.totalorder %s1810_s11, %s1810_s11 }
  0x29   : > { %p1813_p13 = pnand %p1811_p6, %p1749_p7  ;;  %p1820_p8 = por %p1819_p4, %p1818_p1 }
  0x2b   : > { %p1814_p0 = pneg %p1813_p13 }
  0x2d   : > { %p1821_p9 = pnand %p1820_p8, %p1814_p0 }
  0x2f   : > { %1824 = shalt.err (!%p1821_p9)
}
  0x30   : > { %1642 = dma.hbm_to_vmem [thread:$0]  (!%p2004_p5), %s2149_s2, 2048, %s258_s23, [#allocation10], %s1917_s15, %s1917_s15, %s1918_s16  }
  0x31   : > { %s1836_s14 = scalar_lea.vmem %s274_s8, 2048  ;;  %p1844_p6 = scmp.lt.s32.totalorder %s274_s8, %s274_s8 }
  0x32   : > { %p1837_p10 = scmp.ne.s32.totalorder %s274_s8, %s1836_s14  ;;  %p1845_p13 = scmp.lt.s32.totalorder %s1836_s14, %s1836_s14 }
  0x34   : > { %p1839_p11 = pnand %p1837_p10, %p1749_p7  ;;  %p1846_p0 = por %p1845_p13, %p1844_p6 }
  0x36   : > { %p1840_p12 = pneg %p1839_p11 }
  0x38   : > { %p1847_p1 = pnand %p1846_p0, %p1840_p12 }
  0x3a   : > { %1850 = shalt.err (!%p1847_p1)
}
  0x3b   : > { %1645 = dma.hbm_to_vmem [thread:$0]  (!%p2004_p5), %s2151_s4, 2048, %s274_s8, [#allocation13], %s1917_s15, %s1917_s15, %s1918_s16  }
  0x3c   : > { %299 = sbr.rel (%p1996_p3) target bundleno = 1146 (0x47a), region = 48 }
  0x41   : > { %1888 = dma.done.wait (%p1992_p2), [#allocation7], 256  }
  0x42   : > { %1890 = vsyncadd (%p1992_p2), [#allocation7], 4294967040 }
  0x43   : > { %1892 = dma.done.wait (%p1992_p2), [#allocation10], 2176  }
  0x44   : > { %1894 = vsyncadd (%p1992_p2), [#allocation10], 4294965120 }
  0x45   : > { %1896 = dma.done.wait (%p1992_p2), [#allocation13], 2048  }
  0x46   : > { %1898 = vsyncadd (%p1992_p2), [#allocation13], 4294965248  ;;  %p1357_p3 = scmp.ne.s32.totalorder %s1905_s24, 0 }
  0x48   : > { %347 = sbr.rel (%p1357_p3) target bundleno = 224 (0xe0), region = 68 }
  0x4d   : > { %vm359_vm0 = vcmask 130048   ;;  %v1443_v0 = vld [vmem:[#allocation6 + $0x8] sm:$0xff]   ;;  %v1439_v1 = vld [vmem:[#allocation6] sm:$0xff]   ;;  %vm352_vm1 = vcmask 122880   ;;  %v1921_v5 = vmov 0.0   ;;  %vm367_vm2 = vcmask 7168  }
  0x4e   : > { %v1444_v2 = vunpack.c.l.bf16 %v1443_v0  ;;  %v1440_v3 = vunpack.c.l.bf16 %v1439_v1  ;;  %v1445_v4 = vunpack.c.h.bf16 %v1443_v0  ;;  %354 = vst.msk [vmem:[#allocation3 + $0x1] sm:$0x1] %vm352_vm1, %v1921_v5  ;;  %353 = vst.msk [vmem:[#allocation3] sm:$0x1] %vm352_vm1, %v1921_v5  ;;  %v1441_v6 = vunpack.c.h.bf16 %v1439_v1 }
  0x50   : > { %v386_v7 = vsel %vm359_vm0, %v1444_v2, 0.0  ;;  %v360_v8 = vsel %vm359_vm0, %v1440_v3, 0.0  ;;  %v389_v9 = vsel %vm359_vm0, %v1445_v4, 0.0  ;;  %v363_v10 = vsel %vm359_vm0, %v1441_v6, 0.0 }
  0x51   : > { %387 = vadd.xlane.f32.xlu1 %v386_v7  ;;  %361 = vadd.xlane.f32.xlu0 %v360_v8  ;;  %v398_v11 = vadd.f32 %v389_v9, %v386_v7  ;;  %v371_v12 = vadd.f32 %v363_v10, %v360_v8 }
  0x53   : > { %v399_v13 = vrot.slane %v398_v11, 4  ;;  %v372_v14 = vrot.slane %v371_v12, 4 }
  0x55   : > { %390 = vadd.xlane.f32.xlu1 %v389_v9  ;;  %v400_v15 = vadd.f32 %v399_v13, %v398_v11  ;;  %364 = vadd.xlane.f32.xlu0 %v363_v10  ;;  %v373_v16 = vadd.f32 %v372_v14, %v371_v12  ;;  %v397_v23 = vld [vmem:[#allocation3 + $0x1] sm:$0x1]  ;;  %v370_v24 = vld [vmem:[#allocation3] sm:$0x1] }
  0x57   : > { %v401_v17 = vrot.slane %v400_v15, 2  ;;  %v374_v18 = vrot.slane %v373_v16, 2 }
  0x59   : > { %v402_v19 = vadd.f32 %v401_v17, %v400_v15  ;;  %v375_v20 = vadd.f32 %v374_v18, %v373_v16 }
  0x5b   : > { %v403_v21 = vrot.slane %v402_v19, 1  ;;  %v376_v22 = vrot.slane %v375_v20, 1 }
  0x5d   : > { %v404_v25 = vadd.f32 %v403_v21, %v402_v19  ;;  %v377_v26 = vadd.f32 %v376_v22, %v375_v20 }
  0x5f   : > { %v405_v27 = vadd.f32 %v404_v25, %v397_v23  ;;  %v378_v28 = vadd.f32 %v377_v26, %v370_v24 }
  0x61   : > { %406 = vst.msk [vmem:[#allocation3 + $0x1] sm:$0x1] %vm352_vm1, %v405_v27  ;;  %380 = vst.msk [vmem:[#allocation3] sm:$0x1] %vm352_vm1, %v378_v28 }
  0xda   : > { %v388_v29 = vpop.xlane.xlu1 %387  ;;  %v362_v30 = vpop.xlane.xlu0 %361 }
  0xdb   : > { %1358 = vst.msk [vmem:[#allocation2 + $0x10] sm:$0xff] %vm367_vm2, %v388_v29  ;;  %368 = vst.msk [vmem:[#allocation2] sm:$0xff] %vm367_vm2, %v362_v30 }
  0xde   : > { %v391_v31 = vpop.xlane.xlu1 %390  ;;  %v365_v32 = vpop.xlane.xlu0 %364 }
  0xdf   : > { %1359 = vst.msk [vmem:[#allocation2 + $0x18] sm:$0xff] %vm367_vm2, %v391_v31  ;;  %369 = vst.msk [vmem:[#allocation2 + $0x8] sm:$0xff] %vm367_vm2, %v365_v32 }
  0xe0 PF: > { %p407_p2 = scmp.eq.s32.totalorder %s1905_s24, 1 }
  0xe1   : > { %v430_v40 = vld [vmem:[#allocation3] sm:$0x1] (%p407_p2)  ;;  %v1922_v41 = vmov (%p407_p2), 0.0   ;;  %v431_v43 = vld [vmem:[#allocation3 + $0x1] sm:$0x1] (%p407_p2)  ;;  %v1697_v46 = vld [vmem:[#allocation11 + $0x38] sm:$0xff] (%p407_p2)  }
  0xe2   : > { %412 = sbr.rel (!%p407_p2) target bundleno = 459 (0x1cb), region = 76  ;;  %v413_v33 = vld [vmem:[#allocation2] sm:$0xff] (%p407_p2)  ;;  %v415_v35 = vld [vmem:[#allocation2 + $0x10] sm:$0xff] (%p407_p2)  ;;  %1514 = vmatprep.subr.bf16.mxu0 (%p407_p2), %v1922_v41  ;;  %1534 = vmatprep.subr.bf16.mxu1 (%p407_p2), %v1922_v41  ;;  %v432_v44 = vmax.f32 (%p407_p2), %v430_v40, 1.0  ;;  %v433_v45 = vmax.f32 (%p407_p2), %v431_v43, 1.0  ;;  %vm1923_vm3 = vmmov (%p407_p2), 0  }
  0xe3   : > { %v417_v37 = vmax.f32 (%p407_p2), %v413_v33, 1.0  ;;  %v419_v39 = vmax.f32 (%p407_p2), %v415_v35, 1.0  ;;  %v1698_v47 = vld [vmem:[#allocation11 + $0x78] sm:$0xff] (%p407_p2)   ;;  %1515 = vmatpush3.bf16.msra.mxu0 (%p407_p2), %v1697_v46  ;;  %v1699_v48 = vld [vmem:[#allocation11 + $0x30] sm:$0xff] (%p407_p2)   ;;  %1530 = vmatprep.mubr.msk.bf16.mxu0 (%p407_p2), %vm1923_vm3, %v1922_v41  ;;  %v1701_v50 = vld [vmem:[#allocation11 + $0x28] sm:$0xff] (%p407_p2)   ;;  %vm425_vm4 = vcmask (%p407_p2), 7168  }
  0xe4   : > { %1535 = vmatpush3.bf16.msra.mxu1 (%p407_p2), %v1698_v47  ;;  %1516 = vmatprep.subr.bf16.mxu0 (%p407_p2), %v1922_v41  ;;  %v1700_v49 = vld [vmem:[#allocation11 + $0x70] sm:$0xff] (%p407_p2)   ;;  %v1702_v51 = vld [vmem:[#allocation11 + $0x68] sm:$0xff] (%p407_p2)   ;;  %v1703_v52 = vld [vmem:[#allocation11 + $0x20] sm:$0xff] (%p407_p2)   ;;  %vm436_vm5 = vcmask (%p407_p2), 122880  }
  0xe5   : > { %1714 = vrsqrt.f32 (%p407_p2), %v417_v37  ;;  %1536 = vmatprep.subr.bf16.mxu1 (%p407_p2), %v1922_v41  ;;  %1550 = vmatprep.mubr.msk.bf16.mxu1 (%p407_p2), %vm1923_vm3, %v1922_v41  ;;  %v1704_v53 = vld [vmem:[#allocation11 + $0x60] sm:$0xff] (%p407_p2)   ;;  %v1705_v56 = vld [vmem:[#allocation11 + $0x18] sm:$0xff] (%p407_p2)   ;;  %v1707_v62 = vld [vmem:[#allocation11 + $0x10] sm:$0xff] (%p407_p2)  }
  0xe6   : > { %v414_v34 = vld [vmem:[#allocation2 + $0x8] sm:$0xff] (%p407_p2)  ;;  %v416_v36 = vld [vmem:[#allocation2 + $0x18] sm:$0xff] (%p407_p2) }
  0xe7   : > { %v418_v38 = vmax.f32 %v414_v34, 1.0  ;;  %v420_v42 = vmax.f32 %v416_v36, 1.0  ;;  %1517 = vmatpush3.bf16.msra.mxu0 %v1699_v48  ;;  %v1706_v58 = vld [vmem:[#allocation11 + $0x58] sm:$0xff]   ;;  %v1708_v63 = vld [vmem:[#allocation11 + $0x50] sm:$0xff]   ;;  %v1709_v0 = vld [vmem:[#allocation11 + $0x8] sm:$0xff]  }
  0xe8   : > { %1537 = vmatpush3.bf16.msra.mxu1 %v1700_v49  ;;  %1518 = vmatprep.subr.bf16.mxu0 %v1922_v41  ;;  %v1710_v1 = vld [vmem:[#allocation11 + $0x48] sm:$0xff]   ;;  %v1711_v2 = vld [vmem:[#allocation11] sm:$0xff]   ;;  %v1713_v4 = vld [vmem:[#allocation9] sm:$0xff]  }
  0xe9   : > { %1716 = vrsqrt.f32 %v418_v38  ;;  %1538 = vmatprep.subr.bf16.mxu1 %v1922_v41  ;;  %v1712_v3 = vld [vmem:[#allocation11 + $0x40] sm:$0xff]  }
  0xea   : > { %1718 = vrsqrt.f32 %v419_v39 }
  0xeb   : > { %1720 = vrsqrt.f32 %v420_v42  ;;  %1519 = vmatpush3.bf16.msra.mxu0 %v1701_v50 }
  0xec   : > { %1722 = vrsqrt.f32 %v432_v44  ;;  %1539 = vmatpush3.bf16.msra.mxu1 %v1702_v51  ;;  %1520 = vmatprep.subr.bf16.mxu0 %v1922_v41 }
  0xed   : > { %1724 = vrsqrt.f32 %v433_v45  ;;  %1540 = vmatprep.subr.bf16.mxu1 %v1922_v41 }
  0xef   : > { %1521 = vmatpush3.bf16.msra.mxu0 %v1703_v52 }
  0xf0   : > { %1541 = vmatpush3.bf16.msra.mxu1 %v1704_v53  ;;  %1522 = vmatprep.subr.bf16.mxu0 %v1922_v41 }
  0xf1   : > { %1542 = vmatprep.subr.bf16.mxu1 %v1922_v41 }
  0xf2   : > { %v1715_v54 = vpop.eup %1714 }
  0xf3   : > { %426 = vst.msk [vmem:[#allocation2] sm:$0xff] %vm425_vm4, %v1715_v54  ;;  %1523 = vmatpush3.bf16.msra.mxu0 %v1705_v56 }
  0xf4   : > { %1543 = vmatpush3.bf16.msra.mxu1 %v1706_v58  ;;  %1524 = vmatprep.subr.bf16.mxu0 %v1922_v41 }
  0xf5   : > { %1544 = vmatprep.subr.bf16.mxu1 %v1922_v41 }
  0xf6   : > { %v1717_v55 = vpop.eup %1716 }
  0xf7   : > { %v1719_v57 = vpop.eup %1718  ;;  %427 = vst.msk [vmem:[#allocation2 + $0x8] sm:$0xff] %vm425_vm4, %v1717_v55  ;;  %1525 = vmatpush3.bf16.msra.mxu0 %v1707_v62 }
  0xf8   : > { %v1721_v59 = vpop.eup %1720  ;;  %428 = vst.msk [vmem:[#allocation2 + $0x10] sm:$0xff] %vm425_vm4, %v1719_v57  ;;  %1545 = vmatpush3.bf16.msra.mxu1 %v1708_v63  ;;  %1526 = vmatprep.subr.bf16.mxu0 %v1922_v41 }
  0xf9   : > { %v1723_v60 = vpop.eup %1722  ;;  %429 = vst.msk [vmem:[#allocation2 + $0x18] sm:$0xff] %vm425_vm4, %v1721_v59  ;;  %1546 = vmatprep.subr.bf16.mxu1 %v1922_v41 }
  0xfa   : > { %v1725_v61 = vpop.eup %1724  ;;  %437 = vst.msk [vmem:[#allocation3] sm:$0x1] %vm436_vm5, %v1723_v60 }
  0xfb   : > { %438 = vst.msk [vmem:[#allocation3 + $0x1] sm:$0x1] %vm436_vm5, %v1725_v61  ;;  %1527 = vmatpush3.bf16.msra.mxu0 %v1709_v0 }
  0xfc   : > { %1547 = vmatpush3.bf16.msra.mxu1 %v1710_v1  ;;  %1528 = vmatprep.subr.bf16.mxu0 %v1922_v41 }
  0xfd   : > { %1548 = vmatprep.subr.bf16.mxu1 %v1922_v41 }
  0xff   : > { %1529 = vmatpush3.bf16.msra.mxu0 %v1711_v2 }
 0x100   : > { %1549 = vmatpush3.bf16.msra.mxu1 %v1712_v3 }
 0x102   : > { %1531 = vmatmul.mubr.bf16.vlgmr.msra.gmra.mxu0 %v1713_v4 }
 0x103   : > { %1551 = vmatmul.mubr.bf16.vlgmr.msra.gmra.mxu1 %v1713_v4 }
 0x1c2   : > { %v545_v5 = vpop.f32.mrf.mxu0 }
 0x1c3   : > { %v661_v6 = vpop.f32.mrf.mxu1 }
 0x1c4   : > { %v1532_v7 = vpop.f32.mrf.mxu0 }
 0x1c5   : > { %v1552_v8 = vpop.f32.mrf.mxu1 }
 0x1c6   : > { %v548_v9 = vpop.f32.mrf.mxu0 }
 0x1c7   : > { %v1449_v10 = vpack.c.bf16 %v548_v9, %v545_v5  ;;  %v664_v11 = vpop.f32.mrf.mxu1 }
 0x1c8   : > { %v1454_v12 = vpack.c.bf16 %v664_v11, %v661_v6  ;;  %v1533_v13 = vpop.f32.mrf.mxu0 }
 0x1c9   : > { %1450 = vst [vmem:[#allocation4] sm:$0xff] %v1449_v10   ;;  %v1553_v14 = vpop.f32.mrf.mxu1 }
 0x1ca   : > { %1455 = vst [vmem:[#allocation4 + $0x8] sm:$0xff] %v1454_v12  }
 0x1cb PF: > { %p679_p5 = scmp.eq.s32.totalorder %s1905_s24, 2 }
 0x1cc   : > { %v1726_v15 = vld [vmem:[#allocation12 + $0x38] sm:$0xff] (%p679_p5)   ;;  %v1924_v16 = vmov (%p679_p5), 0.0   ;;  %v1728_v18 = vld [vmem:[#allocation12 + $0x30] sm:$0xff] (%p679_p5)   ;;  %vm1925_vm6 = vmmov (%p679_p5), 0   ;;  %v1730_v20 = vld [vmem:[#allocation12 + $0x28] sm:$0xff] (%p679_p5)  }
 0x1cd   : > { %683 = sbr.rel (!%p679_p5) target bundleno = 694 (0x2b6), region = 80  ;;  %1554 = vmatprep.subr.bf16.mxu0 (%p679_p5), %v1924_v16  ;;  %1574 = vmatprep.subr.bf16.mxu1 (%p679_p5), %v1924_v16  ;;  %v1727_v17 = vld [vmem:[#allocation12 + $0x78] sm:$0xff] (%p679_p5)   ;;  %v1729_v19 = vld [vmem:[#allocation12 + $0x70] sm:$0xff] (%p679_p5)   ;;  %v1731_v21 = vld [vmem:[#allocation12 + $0x68] sm:$0xff] (%p679_p5)  }
 0x1ce   : > { %1555 = vmatpush3.bf16.msra.mxu0 (%p679_p5), %v1726_v15  ;;  %1570 = vmatprep.mubr.msk.bf16.mxu0 (%p679_p5), %vm1925_vm6, %v1924_v16  ;;  %v1732_v22 = vld [vmem:[#allocation12 + $0x20] sm:$0xff] (%p679_p5)   ;;  %v1734_v24 = vld [vmem:[#allocation12 + $0x18] sm:$0xff] (%p679_p5)   ;;  %v1736_v26 = vld [vmem:[#allocation12 + $0x10] sm:$0xff] (%p679_p5)  }
 0x1cf   : > { %1575 = vmatpush3.bf16.msra.mxu1 (%p679_p5), %v1727_v17  ;;  %1556 = vmatprep.subr.bf16.mxu0 (%p679_p5), %v1924_v16  ;;  %v1733_v23 = vld [vmem:[#allocation12 + $0x60] sm:$0xff] (%p679_p5)   ;;  %v1735_v25 = vld [vmem:[#allocation12 + $0x58] sm:$0xff] (%p679_p5)   ;;  %v1737_v27 = vld [vmem:[#allocation12 + $0x50] sm:$0xff] (%p679_p5)  }
 0x1d0   : > { %1576 = vmatprep.subr.bf16.mxu1 (%p679_p5), %v1924_v16  ;;  %1590 = vmatprep.mubr.msk.bf16.mxu1 (%p679_p5), %vm1925_vm6, %v1924_v16  ;;  %v1738_v28 = vld [vmem:[#allocation12 + $0x8] sm:$0xff] (%p679_p5)   ;;  %v1740_v30 = vld [vmem:[#allocation12] sm:$0xff] (%p679_p5)  }
 0x1d1   : > { %v1739_v29 = vld [vmem:[#allocation12 + $0x48] sm:$0xff] (%p679_p5)   ;;  %v1741_v31 = vld [vmem:[#allocation12 + $0x40] sm:$0xff] (%p679_p5)  }
 0x1d2   : > { %1557 = vmatpush3.bf16.msra.mxu0 %v1728_v18  ;;  %v1742_v32 = vld [vmem:[#allocation5] sm:$0xff]   ;;  %v1404_v33 = vld [vmem:[%s2152_s5] ss:$0 sm:$0xff] }
 0x1d3   : > { %1577 = vmatpush3.bf16.msra.mxu1 %v1729_v19  ;;  %1558 = vmatprep.subr.bf16.mxu0 %v1924_v16  ;;  %932 = vst [vmem:[#allocation14] sm:$0x3] %v1404_v33 }
 0x1d4   : > { %1578 = vmatprep.subr.bf16.mxu1 %v1924_v16 }
 0x1d6   : > { %1559 = vmatpush3.bf16.msra.mxu0 %v1730_v20 }
 0x1d7   : > { %1579 = vmatpush3.bf16.msra.mxu1 %v1731_v21  ;;  %1560 = vmatprep.subr.bf16.mxu0 %v1924_v16 }
 0x1d8   : > { %1580 = vmatprep.subr.bf16.mxu1 %v1924_v16 }
 0x1da   : > { %1561 = vmatpush3.bf16.msra.mxu0 %v1732_v22 }
 0x1db   : > { %1581 = vmatpush3.bf16.msra.mxu1 %v1733_v23  ;;  %1562 = vmatprep.subr.bf16.mxu0 %v1924_v16 }
 0x1dc   : > { %1582 = vmatprep.subr.bf16.mxu1 %v1924_v16 }
 0x1de   : > { %1563 = vmatpush3.bf16.msra.mxu0 %v1734_v24 }
 0x1df   : > { %1583 = vmatpush3.bf16.msra.mxu1 %v1735_v25  ;;  %1564 = vmatprep.subr.bf16.mxu0 %v1924_v16 }
 0x1e0   : > { %1584 = vmatprep.subr.bf16.mxu1 %v1924_v16 }
 0x1e2   : > { %1565 = vmatpush3.bf16.msra.mxu0 %v1736_v26 }
 0x1e3   : > { %1585 = vmatpush3.bf16.msra.mxu1 %v1737_v27  ;;  %1566 = vmatprep.subr.bf16.mxu0 %v1924_v16 }
 0x1e4   : > { %1586 = vmatprep.subr.bf16.mxu1 %v1924_v16 }
 0x1e6   : > { %1567 = vmatpush3.bf16.msra.mxu0 %v1738_v28 }
 0x1e7   : > { %1587 = vmatpush3.bf16.msra.mxu1 %v1739_v29  ;;  %1568 = vmatprep.subr.bf16.mxu0 %v1924_v16 }
 0x1e8   : > { %1588 = vmatprep.subr.bf16.mxu1 %v1924_v16 }
 0x1ea   : > { %1569 = vmatpush3.bf16.msra.mxu0 %v1740_v30 }
 0x1eb   : > { %1589 = vmatpush3.bf16.msra.mxu1 %v1741_v31 }
 0x1ed   : > { %1571 = vmatmul.mubr.bf16.vlgmr.msra.gmra.mxu0 %v1742_v32 }
 0x1ee   : > { %1591 = vmatmul.mubr.bf16.vlgmr.msra.gmra.mxu1 %v1742_v32 }
 0x2ad   : > { %v790_v34 = vpop.f32.mrf.mxu0 }
 0x2ae   : > { %v906_v35 = vpop.f32.mrf.mxu1 }
 0x2af   : > { %v1572_v36 = vpop.f32.mrf.mxu0 }
 0x2b0   : > { %v1592_v37 = vpop.f32.mrf.mxu1 }
 0x2b1   : > { %v793_v38 = vpop.f32.mrf.mxu0 }
 0x2b2   : > { %v1459_v39 = vpack.c.bf16 %v793_v38, %v790_v34  ;;  %v909_v40 = vpop.f32.mrf.mxu1 }
 0x2b3   : > { %v1464_v41 = vpack.c.bf16 %v909_v40, %v906_v35  ;;  %v1573_v42 = vpop.f32.mrf.mxu0 }
 0x2b4   : > { %1460 = vst [vmem:[#allocation4] sm:$0xff] %v1459_v39   ;;  %v1593_v43 = vpop.f32.mrf.mxu1 }
 0x2b5   : > { %1465 = vst [vmem:[#allocation4 + $0x8] sm:$0xff] %v1464_v41  }
 0x2b6 PF: > { %p1405_p7 = scmp.le.s32.totalorder %s1905_s24, 0 }
 0x2b7   : > { %p1416_p4 = scmp.ne.s32.totalorder (!%p1405_p7), %s1905_s24, 1 }
 0x2b8   : > { %936 = sbr.rel (%p1405_p7) target bundleno = 1131 (0x46b), region = 84 }
 0x2bd   : > { %v1745_v44 = vld [vmem:[#allocation4] sm:$0xff]   ;;  %v944_v45 = vlaneseq  ;;  %v1926_v46 = vmov 0.0   ;;  %v1746_v47 = vld [vmem:[#allocation4 + $0x8] sm:$0xff]   ;;  %vm1927_vm7 = vmmov 0   ;;  %v939_v48 = vld [vmem:[#allocation3] sm:$0x1] }
 0x2be   : > { %1594 = vmatprep.subr.bf16.mxu0 %v1926_v46  ;;  %1600 = vmatprep.subr.bf16.mxu1 %v1926_v46  ;;  %v940_v49 = vpack.c.bf16 %v939_v48, %v939_v48  ;;  %v1033_v51 = vld [vmem:[#allocation3 + $0x1] sm:$0x1]  ;;  %v1414_v52 = vld [vmem:[#allocation2 + $0x10] sm:$0xff]  ;;  %v1928_v57 = vmov 0   ;;  %v1415_v60 = vld [vmem:[#allocation2 + $0x18] sm:$0xff]  ;;  %vm967_vm8 = vcmask 130048  }
 0x2bf   : > { %1595 = vmatpush3.bf16.msra.mxu0 %v1745_v44  ;;  %1596 = vmatprep.mubr.msk.bf16.mxu0 %vm1927_vm7, %v1926_v46  ;;  %v945_v50 = vshrl.u32 %v944_v45, 7  ;;  %v1013_v53 = vld [vmem:[#allocation2] sm:$0xff]  ;;  %v1034_v56 = vpack.c.bf16 %v1033_v51, %v1033_v51  ;;  %v1014_v61 = vld [vmem:[#allocation2 + $0x8] sm:$0xff]  ;;  %v937_v62 = vld [vmem:[#allocation6] sm:$0xf] }
 0x2c0   : > { %1601 = vmatpush3.bf16.msra.mxu1 %v1746_v47  ;;  %1602 = vmatprep.mubr.msk.bf16.mxu1 %vm1927_vm7, %v1926_v46  ;;  %v942_v54 = vpack.i.b16 %v940_v49, %v940_v49  ;;  %v938_v63 = vld [vmem:[#allocation6 + $0x4] sm:$0xf]  ;;  %v1030_v2 = vld [vmem:[#allocation6 + $0x8] sm:$0xf]  ;;  %v1031_v3 = vld [vmem:[#allocation6 + $0xc] sm:$0xf] }
 0x2c1   : > { %v946_v55 = vsub.s32 0, %v945_v50  ;;  %1744 = vset.pattern.permute.xlu1 %v1928_v57  ;;  %1743 = vset.pattern.permute.xlu0 %v1928_v57  ;;  %v1036_v59 = vpack.i.b16 %v1034_v56, %v1034_v56 }
 0x2c2   : > { %1112 = vperm.xlu1 %1744, %v1414_v52   ;;  %1017 = vperm.xlu0 %1743, %v1013_v53  }
 0x2c3   : > { %v947_v58 = vrot.slane %v942_v54, %v946_v55  ;;  %v1041_v1 = vrot.slane %v1036_v59, %v946_v55 }
 0x2c5   : > { %v1406_v0 = vcombine.low %v947_v58, %v947_v58  ;;  %v1410_v6 = vcombine.low %v1041_v1, %v1041_v1 }
 0x2c6   : > { %1117 = vperm.xlu1 %1744, %v1415_v60   ;;  %1022 = vperm.xlu0 %1743, %v1014_v61  }
 0x2c7   : > { %v952_v4 = vmul.bf16 %v1406_v0, %v937_v62  ;;  %v953_v5 = vmul.bf16 %v1406_v0, %v938_v63  ;;  %v1046_v8 = vmul.bf16 %v1410_v6, %v1030_v2  ;;  %v1047_v9 = vmul.bf16 %v1410_v6, %v1031_v3 }
 0x2c9   : > { %v1407_v7 = vcombine.low %v952_v4, %v953_v5  ;;  %v1411_v10 = vcombine.low %v1046_v8, %v1047_v9 }
 0x2cb   : > { %1597 = vmatmul.mubr.msk.bf16.vlgmr.msra.gmra.mxu0 %vm967_vm8, %v1407_v7  ;;  %1603 = vmatmul.mubr.msk.bf16.vlgmr.msra.gmra.mxu1 %vm967_vm8, %v1411_v10 }
 0x33d   : > { %v1018_v11 = vpop.permute.xlu0 %1017  ;;  %v1113_v12 = vpop.permute.xlu1 %1112 }
 0x341   : > { %v1023_v17 = vpop.permute.xlu0 %1022  ;;  %v1118_v21 = vpop.permute.xlu1 %1117 }
 0x38b   : > { %v1005_v13 = vpop.f32.mrf.mxu0  ;;  %v1099_v15 = vpop.f32.mrf.mxu1 }
 0x38c   : > { %v1025_v14 = vmul.f32 %v1018_v11, %v1005_v13  ;;  %v1120_v18 = vmul.f32 %v1113_v12, %v1099_v15 }
 0x38d   : > { %v1598_v16 = vpop.f32.mrf.mxu0  ;;  %v1604_v19 = vpop.f32.mrf.mxu1 }
 0x38e   : > { %v1122_v22 = vadd.f32 %v1120_v18, %v1025_v14  ;;  %1126 = sbr.rel (%p1416_p4) target bundleno = 923 (0x39b), region = 88 }
 0x38f   : > { %v1008_v20 = vpop.f32.mrf.mxu0  ;;  %v1102_v24 = vpop.f32.mrf.mxu1 }
 0x390   : > { %v1026_v23 = vmul.f32 %v1023_v17, %v1008_v20  ;;  %v1121_v26 = vmul.f32 %v1118_v21, %v1102_v24 }
 0x391   : > { %v1599_v25 = vpop.f32.mrf.mxu0  ;;  %v1605_v27 = vpop.f32.mrf.mxu1 }
 0x392   : > { %v1123_v28 = vadd.f32 %v1121_v26, %v1026_v23 }
 0x393   : > { %v1417_v29 = vld [vmem:[%s2150_s3] ss:$0 sm:$0xff] }
 0x394   : > { %v1134_v30 = vadd.f32 %v1417_v29, %v1122_v22  ;;  %v1135_v31 = vadd.f32 %v1417_v29, %v1123_v28 }
 0x396   : > { %v1136_v32 = vmax.f32 %v1134_v30, 0.0  ;;  %v1137_v33 = vmax.f32 %v1135_v31, 0.0 }
 0x398   : > { %v1469_v34 = vpack.c.bf16 %v1137_v33, %v1136_v32 }
 0x39a   : > { %1470 = vst [vmem:[#allocation5] sm:$0xff] %v1469_v34  }
 0x39b PF: > { %p1420_p8 = scmp.ne.s32.totalorder %s1905_s24, 2 }
 0x39d   : > { %1154 = sbr.rel (%p1420_p8) target bundleno = 1131 (0x46b), region = 92 }
 0x3a2   : > { %v1929_v35 = vmov 0.0   ;;  %vm1930_vm9 = vmmov 0   ;;  %v1156_v36 = vld [vmem:[%s2153_s6] sm:$0x3]  ;;  %v1155_v37 = vld [vmem:[#allocation14] sm:$0x3] }
 0x3a3   : > { %1606 = vmatprep.subr.mxu0 %v1929_v35  ;;  %1610 = vmatprep.mubr.msk.f32.mxu0 %vm1930_vm9, %v1929_v35 }
 0x3a4   : > { %1607 = vmatpush3.msra.mxu0 %v1123_v28 }
 0x3a5   : > { %1608 = vmatprep.subr.mxu0 %v1929_v35 }
 0x3a6   : > { %1609 = vmatpush3.msra.mxu0 %v1122_v22 }
 0x3a7   : > { %1611 = vmatmul.mubr.msk.f32.vlgmr.msra.gmra.mxu0 %vm967_vm8, %v1156_v36 }
 0x467   : > { %v1226_v38 = vpop.f32.mrf.mxu0 }
 0x468   : > { %v1230_v39 = vadd.f32 %v1226_v38, %v1155_v37 }
 0x469   : > { %v1612_v40 = vpop.f32.mrf.mxu0 }
 0x46a   : > { %1231 = vst [vmem:[#allocation14] sm:$0x3] %v1230_v39 }
 0x46b PF: > { %p2123_p9 = scmp.eq.s32.totalorder %s1345_s27, 2  ;;  %s1931_s20 = smov [#allocation14]  }
 0x46c   : > { %s1239_s21 = sshll.u32 %s1931_s20, 4  ;;  %s1240_s21 = int_to_ptr.vmem [resolvable:$true] %s1239_s21 }
 0x46d   : > { %s1851_s22 = scalar_lea.vmem %s1240_s21, 32  ;;  %p1858_p6 = scmp.lt.s32.totalorder %s1240_s21, %s1240_s21 }
 0x46e   : > { %p1852_p10 = scmp.ne.s32.totalorder %s1240_s21, %s1851_s22  ;;  %p1859_p13 = scmp.lt.s32.totalorder %s1851_s22, %s1851_s22 }
 0x470   : > { %p1853_p11 = pnand %p1852_p10, %p2123_p9  ;;  %p1860_p0 = por %p1859_p13, %p1858_p6 }
 0x472   : > { %p1854_p12 = pneg %p1853_p11 }
 0x474   : > { %p1861_p1 = pnand %p1860_p0, %p1854_p12 }
 0x476   : > { %1864 = shalt.err (!%p1861_p1)
}
 0x477   : > { %1630 = dma.vmem_to_hbm [thread:$0]  (%p2123_p9), %s1240_s21, 32, %s2154_s7, [#allocation8]  }
 0x478   : > { %1900 = dma.done.wait (%p2123_p9), [#allocation8], 32  }
 0x479   : > { %1902 = vsyncadd (%p2123_p9), [#allocation8], 4294967264 }
 0x47a PF: > { %s21_s26 = sadd.s32 1, %s1913_s26   ;;  %s2160_s24 = smov %s1909_s25 }
 0x47b   : > { %p18_p3 = scmp.ge.s32.totalorder %s21_s26, 5   ;;  %s2161_s25 = smov %s2163_s10 }
 0x47d   :  { %20 = sbr.rel (!%p18_p3) target bundleno = 5 (0x5), region = 135 }
 0x482   :  { %1252 = vsyncpa [#allocation7], 1 }
 0x483   :  { %1254 = vsyncpa [#allocation7 + $0x1], 1 }
 0x484   :  { %1255 = vsyncpa [#allocation10], 1 }
 0x485   :  { %1256 = vsyncpa [#allocation13], 1 }
 0x486   :  { %1257 = vsyncpa [#allocation8], 1 }
 0x487   :  { %1259 = vsyncpa [#allocation8 + $0x1], 1 }

</bundles_post_ra>
